<compile_context>
chip_gen: v7x
topology: tpu7x:2x2x1
jax: 0.10.0
libtpu: 0.0.40
codegen_flags: <defaults>
</compile_context>

<pallas_src>
import functools
import math

import jax
import jax.numpy as jnp
from jax.experimental import pallas as pl
from jax.experimental.pallas import tpu as pltpu

_SUBLANE = 8
_TM_CAP = 1024  # rows per tile before we start tiling M (VMEM-safety cap)


def _round_up(v, m):
    return ((v + m - 1) // m) * m


def _linear_sigmoid_kernel(x_ref, w_ref, b_ref, o_ref):
    # (TM, K) @ (K, N) on the MXU with f32 accumulation; bias add on VPU,
    # sigmoid on EUP; store straight back to the (TM, N) output block.
    acc = jnp.dot(x_ref[...], w_ref[...], preferred_element_type=jnp.float32)
    acc = acc + b_ref[...]                      # (TM, N) + (1, N) broadcast
    o_ref[...] = jax.nn.sigmoid(acc).astype(o_ref.dtype)


@functools.partial(jax.jit, static_argnames=("tm_cap",))
def linear_sigmoid(x, weight, bias, *, tm_cap=_TM_CAP):
    """x: (..., K); weight: (K, N) (= torch W^T); bias: (N,) -> (..., N)."""
    *lead, K = x.shape
    Kw, N = weight.shape
    assert Kw == K, (Kw, K)
    M = math.prod(lead) if lead else 1
    x2d = x.reshape(M, K)
    b2d = bias.reshape(1, N)

    # Single tile covering all rows when M is small (grid collapses to 1 step,
    # no per-step overhead, no ragged tail); fall back to tm_cap-row tiles with
    # Pallas OOB masking on the last tile when M is large.
    tm = min(_round_up(M, _SUBLANE), _round_up(tm_cap, _SUBLANE))
    grid_m = pl.cdiv(M, tm)

    itemsize = jnp.dtype(x.dtype).itemsize
    cost = pl.CostEstimate(
        flops=2 * M * K * N,
        transcendentals=M * N,  # sigmoid
        bytes_accessed=(M * K + K * N + N + M * N) * itemsize,
    )

    out2d = pl.pallas_call(
        _linear_sigmoid_kernel,
        out_shape=jax.ShapeDtypeStruct((M, N), x.dtype),
        grid_spec=pl.GridSpec(
            grid=(grid_m,),
            in_specs=[
                pl.BlockSpec((tm, K), lambda i: (i, 0)),   # streamed x rows
                pl.BlockSpec((K, N), lambda i: (0, 0)),    # resident weight
                pl.BlockSpec((1, N), lambda i: (0, 0)),    # resident bias
            ],
            out_specs=pl.BlockSpec((tm, N), lambda i: (i, 0)),
        ),
        compiler_params=pltpu.CompilerParams(
            # Row tiles are independent; only matters when grid_m > 1
            # (megacore sharding on v7x). Harmless no-op when grid_m == 1.
            dimension_semantics=("parallel",),
        ),
        cost_estimate=cost,
    )(x2d, weight, b2d)

    return out2d.reshape(*lead, N)


if __name__ == "__main__":
    # Shapes from the original module: x1 = torch.randn(1, 3, 64, 64) with the
    # (implicit) linear acting on the last dim: Linear(64 -> 64).
    B, C, H, K, N = 1, 3, 64, 64, 64

    key = jax.random.PRNGKey(0)
    kx, kw, kb = jax.random.split(key, 3)
    x = jax.random.normal(kx, (B, C, H, K), dtype=jnp.float32)
    # torch nn.Linear stores W as (N, K); we keep its transpose (K, N).
    w = jax.random.normal(kw, (K, N), dtype=jnp.float32) * 0.05
    b = jax.random.normal(kb, (N,), dtype=jnp.float32) * 0.05

    out = linear_sigmoid(x, w, b)
    jax.block_until_ready(out)

    # Correctness check against plain-JAX reference.
    ref = jax.nn.sigmoid(jnp.einsum("bchk,kn->bchn", x, w) + b)
    assert out.shape == (B, C, H, N)
    assert jnp.allclose(out, ref, atol=1e-5, rtol=1e-5)

    print("KERNEL_OK")
</pallas_src>

<mosaic_0001>
module attributes {stable_mosaic.version = 11 : i64} {
  func.func @_linear_sigmoid_kernel(%arg0: i32, %arg1: memref<192x64xf32, #tpu.memory_space<vmem>>, %arg2: memref<64x64xf32, #tpu.memory_space<vmem>>, %arg3: memref<1x64xf32, #tpu.memory_space<vmem>>, %arg4: memref<192x64xf32, #tpu.memory_space<vmem>>) attributes {dimension_semantics = [#tpu.dimension_semantics<parallel>], iteration_bounds = array<i64: 1>, scalar_prefetch = 0 : i64, scratch_operands = 0 : i64, tpu.core_type = #tpu.core_type<tc>, window_params = [{transform_indices = @transform_0, window_bounds = array<i64: 192, 64>}, {pipeline_mode = #tpu.pipeline_mode<synchronous>, transform_indices = @transform_1, window_bounds = array<i64: 64, 64>}, {pipeline_mode = #tpu.pipeline_mode<synchronous>, transform_indices = @transform_2, window_bounds = array<i64: 1, 64>}, {transform_indices = @transform_3, window_bounds = array<i64: 192, 64>}]} {
    %c0 = arith.constant 0 : index
    %c0_0 = arith.constant 0 : index
    %0 = vector.load %arg1[%c0, %c0_0] : memref<192x64xf32, #tpu.memory_space<vmem>>, vector<192x64xf32>
    %c0_1 = arith.constant 0 : index
    %c0_2 = arith.constant 0 : index
    %1 = vector.load %arg2[%c0_1, %c0_2] : memref<64x64xf32, #tpu.memory_space<vmem>>, vector<64x64xf32>
    %cst = arith.constant dense<0.000000e+00> : vector<192x64xf32>
    %2 = tpu.matmul %0, %1, %cst {dimension_numbers = #tpu.dot_dimension_numbers<[1], [0], [0], [1], [0, 0, 1, 1], [], []>} : vector<192x64xf32>, vector<64x64xf32>, vector<192x64xf32> -> vector<192x64xf32>
    %c0_3 = arith.constant 0 : index
    %c0_4 = arith.constant 0 : index
    %3 = vector.load %arg3[%c0_3, %c0_4] : memref<1x64xf32, #tpu.memory_space<vmem>>, vector<1x64xf32>
    %4 = vector.broadcast %3 : vector<1x64xf32> to vector<192x64xf32>
    %5 = arith.addf %2, %4 : vector<192x64xf32>
    %6 = arith.negf %5 : vector<192x64xf32>
    %7 = math.exp %6 : vector<192x64xf32>
    %cst_5 = arith.constant 1.000000e+00 : f32
    %8 = vector.broadcast %cst_5 : f32 to vector<192x64xf32>
    %9 = arith.addf %8, %7 : vector<192x64xf32>
    %10 = arith.divf %8, %9 : vector<192x64xf32>
    %c0_6 = arith.constant 0 : index
    %c0_7 = arith.constant 0 : index
    %11 = vector.load %arg4[%c0_6, %c0_7] : memref<192x64xf32, #tpu.memory_space<vmem>>, vector<192x64xf32>
    tpu.vector_store %arg4[%c0_6, %c0_7], %10 {strides = array<i32>} : memref<192x64xf32, #tpu.memory_space<vmem>>, vector<192x64xf32>,
    return
  }
  func.func @transform_0(%arg0: i32) -> (i32, i32) {
    %c0_i32 = arith.constant 0 : i32
    %c0_i32_0 = arith.constant 0 : i32
    return %arg0, %c0_i32 : i32, i32
  }
  func.func @transform_1(%arg0: i32) -> (i32, i32) {
    %c0_i32 = arith.constant 0 : i32
    %c0_i32_0 = arith.constant 0 : i32
    %c0_i32_1 = arith.constant 0 : i32
    return %c0_i32, %c0_i32_0 : i32, i32
  }
  func.func @transform_2(%arg0: i32) -> (i32, i32) {
    %c0_i32 = arith.constant 0 : i32
    %c0_i32_0 = arith.constant 0 : i32
    %c0_i32_1 = arith.constant 0 : i32
    return %c0_i32, %c0_i32_0 : i32, i32
  }
  func.func @transform_3(%arg0: i32) -> (i32, i32) {
    %c0_i32 = arith.constant 0 : i32
    %c0_i32_0 = arith.constant 0 : i32
    return %arg0, %c0_i32 : i32, i32
  }
}

</mosaic_0001>

<bundles_post_ra>
// kernel: linear_sigmoid.1
= control target key start
LH: loop header
LB: loop body
LE: loop exit
PB: predicated region body
PF: predicated region fallthrough
CT: control target
= control target key end

     0   :  { %8 = vsyncpa [#allocation3], 0  ;;  %s1003_s0 = inlined_call_operand.hbm [shape: f32[192,64], index: 0, kind: input, shape index: {}]   ;;  %s1004_s1 = inlined_call_operand.hbm [shape: f32[64,64], index: 1, kind: input, shape index: {}]   ;;  %s1005_s2 = inlined_call_operand.vmem [shape: f32[1,64], index: 2, kind: input, shape index: {}]   ;;  %s1006_s3 = inlined_call_operand.hbm [shape: f32[192,64], index: 3, kind: output, shape index: {}]  }
   0x1   :  { %9 = vsyncpa [#allocation6], 0 }
   0x2   :  { %10 = vsyncpa [#allocation4], 0  ;;  %s856_s12 = smov [#allocation2]   ;;  %s784_s16 = scalar_lea.hbm %s1003_s0, 3072 }
   0x3   :  { %s16_s13 = sshll.u32 %s856_s12, 4  ;;  %p785_p0 = scmp.ne.s32.totalorder %s1003_s0, %s784_s16  ;;  %s17_s13 = int_to_ptr.vmem [resolvable:$true] %s16_s13 }
   0x4   :  { %p788_p1 = scmp.lt.u32.totalorder %s784_s16, %s1003_s0 }
   0x6   :  { %p790_p2 = pnand %p788_p1, %p785_p0 }
   0x8   :  { %793 = shalt.err (!%p790_p2)
}
   0x9   :  { %s794_s21 = scalar_lea.vmem %s17_s13, 3072  ;;  %p799_p4 = scmp.lt.s32.totalorder %s17_s13, %s17_s13 }
   0xa   :  { %p795_p3 = scmp.ne.s32.totalorder %s17_s13, %s794_s21  ;;  %p800_p5 = scmp.lt.s32.totalorder %s794_s21, %s794_s21 }
   0xc   :  { %p801_p6 = por %p800_p5, %p799_p4 }
   0xe   :  { %p802_p7 = pnand %p801_p6, %p795_p3 }
  0x10   :  { %805 = shalt.err (!%p802_p7)
}
  0x11   :  { %s857_s22 = smov 128   ;;  %s858_s23 = smov 8  }
  0x12   :  { %22 = dma.hbm_to_vmem [thread:$0]  %s1003_s0, 3072, %s17_s13, [#allocation3], %s857_s22, %s857_s22, %s858_s23  }
  0x13   :  { %s859_s26 = smov [#allocation5]   ;;  %s806_s30 = scalar_lea.hbm %s1004_s1, 1024 }
  0x14   :  { %s28_s27 = sshll.u32 %s859_s26, 4  ;;  %p807_p8 = scmp.ne.s32.totalorder %s1004_s1, %s806_s30  ;;  %s29_s27 = int_to_ptr.vmem [resolvable:$true] %s28_s27 }
  0x15   :  { %p810_p9 = scmp.lt.u32.totalorder %s806_s30, %s1004_s1 }
  0x17   :  { %p812_p10 = pnand %p810_p9, %p807_p8 }
  0x19   :  { %815 = shalt.err (!%p812_p10)
}
  0x1a   :  { %s816_s8 = scalar_lea.vmem %s29_s27, 1024  ;;  %p821_p12 = scmp.lt.s32.totalorder %s29_s27, %s29_s27 }
  0x1b   :  { %p817_p11 = scmp.ne.s32.totalorder %s29_s27, %s816_s8  ;;  %p822_p13 = scmp.lt.s32.totalorder %s816_s8, %s816_s8 }
  0x1d   :  { %p823_p0 = por %p822_p13, %p821_p12 }
  0x1f   :  { %p824_p1 = pnand %p823_p0, %p817_p11 }
  0x21   :  { %827 = shalt.err (!%p824_p1)
}
  0x22   :  { %34 = dma.hbm_to_vmem [thread:$0]  %s1004_s1, 1024, %s29_s27, [#allocation6], %s857_s22, %s857_s22, %s858_s23  }
  0x23   :  { %850 = dma.done.wait [#allocation3], 3072  }
  0x24   :  { %851 = vsyncadd [#allocation3], 4294964224 }
  0x25   :  { %852 = dma.done.wait [#allocation6], 1024  }
  0x26   :  { %853 = vsyncadd [#allocation6], 4294966272  ;;  %v67_v0 = vld [vmem:[#allocation5] sm:$0xff]  ;;  %v68_v1 = vld [vmem:[#allocation5 + $0x8] sm:$0xff]  ;;  %vm82_vm0 = vcmask 523264  }
  0x27   :  { %v69_v2 = vld [vmem:[#allocation5 + $0x10] sm:$0xff]  ;;  %v659_v3 = vpack.c.bf16 %v68_v1, %v67_v0  ;;  %v70_v4 = vld [vmem:[#allocation5 + $0x18] sm:$0xff]  ;;  %v71_v6 = vld [vmem:[#allocation5 + $0x20] sm:$0xff] }
  0x28   :  { %v663_v5 = vpack.c.bf16 %v70_v4, %v69_v2  ;;  %v72_v7 = vld [vmem:[#allocation5 + $0x28] sm:$0xff]  ;;  %v43_v8 = vld [vmem:[#allocation2] sm:$0xff]  ;;  %v73_v11 = vld [vmem:[#allocation5 + $0x30] sm:$0xff] }
  0x29   :  { %660 = vmatprep.subr.bf16.mxu0 %v659_v3  ;;  %675 = vmatprep.subr.bf16.mxu1 %v659_v3  ;;  %v55_v9 = vld [vmem:[#allocation2 + $0x60] sm:$0xff]  ;;  %v667_v10 = vpack.c.bf16 %v72_v7, %v71_v6  ;;  %v74_v12 = vld [vmem:[#allocation5 + $0x38] sm:$0xff]  ;;  %v44_v14 = vld [vmem:[#allocation2 + $0x8] sm:$0xff] }
  0x2a   :  { %662 = vmatpush3.bf16.msra.mxu0 %v659_v3  ;;  %679 = vmatpush3.bf16.msra.mxu1 %v659_v3  ;;  %v671_v13 = vpack.c.bf16 %v74_v12, %v73_v11  ;;  %v56_v15 = vld [vmem:[#allocation2 + $0x68] sm:$0xff]  ;;  %v45_v16 = vld [vmem:[#allocation2 + $0x10] sm:$0xff]  ;;  %v46_v18 = vld [vmem:[#allocation2 + $0x18] sm:$0xff] }
  0x2b   :  { %664 = vmatprep.subr.bf16.mxu0 %v663_v5  ;;  %676 = vmatprep.subr.bf16.mxu1 %v663_v5  ;;  %v57_v17 = vld [vmem:[#allocation2 + $0x70] sm:$0xff]  ;;  %v58_v19 = vld [vmem:[#allocation2 + $0x78] sm:$0xff]  ;;  %v47_v20 = vld [vmem:[#allocation2 + $0x20] sm:$0xff] }
  0x2c   :  { %623 = vmatprep.mubr.msk.f32.mxu0 %vm82_vm0, %v43_v8  ;;  %641 = vmatprep.mubr.msk.f32.mxu1 %vm82_vm0, %v55_v9  ;;  %v59_v21 = vld [vmem:[#allocation2 + $0x80] sm:$0xff]  ;;  %v48_v22 = vld [vmem:[#allocation2 + $0x28] sm:$0xff]  ;;  %v49_v24 = vld [vmem:[#allocation2 + $0x30] sm:$0xff] }
  0x2d   :  { %v60_v23 = vld [vmem:[#allocation2 + $0x88] sm:$0xff]  ;;  %v61_v25 = vld [vmem:[#allocation2 + $0x90] sm:$0xff]  ;;  %v50_v26 = vld [vmem:[#allocation2 + $0x38] sm:$0xff] }
  0x2e   :  { %666 = vmatpush3.bf16.msra.mxu0 %v663_v5  ;;  %680 = vmatpush3.bf16.msra.mxu1 %v663_v5  ;;  %v62_v27 = vld [vmem:[#allocation2 + $0x98] sm:$0xff]  ;;  %v51_v28 = vld [vmem:[#allocation2 + $0x40] sm:$0xff]  ;;  %v52_v30 = vld [vmem:[#allocation2 + $0x48] sm:$0xff] }
  0x2f   :  { %668 = vmatprep.subr.bf16.mxu0 %v667_v10  ;;  %677 = vmatprep.subr.bf16.mxu1 %v667_v10  ;;  %v63_v29 = vld [vmem:[#allocation2 + $0xa0] sm:$0xff]  ;;  %v64_v31 = vld [vmem:[#allocation2 + $0xa8] sm:$0xff]  ;;  %v53_v32 = vld [vmem:[#allocation2 + $0x50] sm:$0xff] }
  0x30   :  { %v65_v33 = vld [vmem:[#allocation2 + $0xb0] sm:$0xff]  ;;  %v54_v34 = vld [vmem:[#allocation2 + $0x58] sm:$0xff]  ;;  %v938_v36 = vld [vmem:[%s1005_s2] ss:$0 sm:$0xff]  ;;  %s860_s2 = smov [#allocation7]  }
  0x31   :  { %v66_v35 = vld [vmem:[#allocation2 + $0xb8] sm:$0xff]  ;;  %s513_s11 = sshll.u32 %s860_s2, 4  ;;  %s514_s11 = int_to_ptr.vmem [resolvable:$true] %s513_s11 }
  0x32   :  { %670 = vmatpush3.bf16.msra.mxu0 %v667_v10  ;;  %681 = vmatpush3.bf16.msra.mxu1 %v667_v10  ;;  %s828_s12 = scalar_lea.vmem %s514_s11, 3072  ;;  %p833_p3 = scmp.lt.s32.totalorder %s514_s11, %s514_s11 }
  0x33   :  { %672 = vmatprep.subr.bf16.mxu0 %v671_v13  ;;  %678 = vmatprep.subr.bf16.mxu1 %v671_v13  ;;  %p829_p2 = scmp.ne.s32.totalorder %s514_s11, %s828_s12  ;;  %p834_p4 = scmp.lt.s32.totalorder %s828_s12, %s828_s12 }
  0x35   :  { %p835_p5 = por %p834_p4, %p833_p3 }
  0x36   :  { %674 = vmatpush3.bf16.msra.mxu0 %v671_v13  ;;  %682 = vmatpush3.bf16.msra.mxu1 %v671_v13 }
  0x37   :  { %p836_p6 = pnand %p835_p5, %p829_p2 }
  0x39   :  { %624 = vmatmul.mubr.msk.f32.vlgmr.msra.gmra.mrb[0].mxu0 %vm82_vm0, %v44_v14  ;;  %642 = vmatmul.mubr.msk.f32.vlgmr.msra.gmra.mrb[0].mxu1 %vm82_vm0, %v56_v15 }
  0x3a   :  { %626 = vmatprep.mubr.msk.f32.mxu0 %vm82_vm0, %v45_v16  ;;  %644 = vmatprep.mubr.msk.f32.mxu1 %vm82_vm0, %v57_v17 }
  0x3d   :  { %627 = vmatmul.mubr.msk.f32.gmra.mrb[2].mxu0 %vm82_vm0, %v46_v18  ;;  %645 = vmatmul.mubr.msk.f32.gmra.mrb[2].mxu1 %vm82_vm0, %v58_v19 }
  0x3e   :  { %629 = vmatprep.mubr.msk.f32.mxu0 %vm82_vm0, %v47_v20  ;;  %647 = vmatprep.mubr.msk.f32.mxu1 %vm82_vm0, %v59_v21 }
  0x41   :  { %630 = vmatmul.mubr.msk.f32.gmra.mrb[4].mxu0 %vm82_vm0, %v48_v22  ;;  %648 = vmatmul.mubr.msk.f32.gmra.mrb[4].mxu1 %vm82_vm0, %v60_v23 }
  0x42   :  { %632 = vmatprep.mubr.msk.f32.mxu0 %vm82_vm0, %v49_v24  ;;  %650 = vmatprep.mubr.msk.f32.mxu1 %vm82_vm0, %v61_v25 }
  0x45   :  { %633 = vmatmul.mubr.msk.f32.gmra.mrb[6].mxu0 %vm82_vm0, %v50_v26  ;;  %651 = vmatmul.mubr.msk.f32.gmra.mrb[6].mxu1 %vm82_vm0, %v62_v27 }
  0x46   :  { %635 = vmatprep.mubr.msk.f32.mxu0 %vm82_vm0, %v51_v28  ;;  %653 = vmatprep.mubr.msk.f32.mxu1 %vm82_vm0, %v63_v29 }
  0x49   :  { %636 = vmatmul.mubr.msk.f32.gmra.mrb[8].mxu0 %vm82_vm0, %v52_v30  ;;  %654 = vmatmul.mubr.msk.f32.gmra.mrb[8].mxu1 %vm82_vm0, %v64_v31 }
  0x4a   :  { %638 = vmatprep.mubr.msk.f32.mxu0 %vm82_vm0, %v53_v32  ;;  %656 = vmatprep.mubr.msk.f32.mxu1 %vm82_vm0, %v65_v33 }
  0x4d   :  { %639 = vmatmul.mubr.msk.f32.gmra.mrb[10].mxu0 %vm82_vm0, %v54_v34  ;;  %657 = vmatmul.mubr.msk.f32.gmra.mrb[10].mxu1 %vm82_vm0, %v66_v35 }
 0x10c   :  { %v625_v37 = vpop.f32.mrb[0].mxu0  ;;  %v643_v38 = vpop.f32.mrb[0].mxu1 }
 0x10d   :  { %v227_v39 = vadd.f32 %v625_v37, %v938_v36  ;;  %v287_v40 = vadd.f32 %v643_v38, %v938_v36  ;;  %v221_v41 = vpop.f32.mrb[1].mxu0  ;;  %v281_v42 = vpop.f32.mrb[1].mxu1 }
 0x10e   :  { %v222_v43 = vadd.f32 %v938_v36, %v221_v41  ;;  %v282_v44 = vadd.f32 %v938_v36, %v281_v42 }
 0x10f   :  { %v552_v45 = vmul.f32 -1.442695, %v227_v39  ;;  %v564_v46 = vmul.f32 -1.442695, %v287_v40 }
 0x110   :  { %v551_v47 = vmul.f32 -1.442695, %v222_v43  ;;  %v563_v48 = vmul.f32 -1.442695, %v282_v44  ;;  %v628_v49 = vpop.f32.mrb[2].mxu0  ;;  %v646_v50 = vpop.f32.mrb[2].mxu1 }
 0x111   :  { %688 = vpow2.f32 %v552_v45  ;;  %v237_v51 = vadd.f32 %v628_v49, %v938_v36  ;;  %v297_v52 = vadd.f32 %v646_v50, %v938_v36  ;;  %v231_v53 = vpop.f32.mrb[3].mxu0  ;;  %v291_v54 = vpop.f32.mrb[3].mxu1 }
 0x112   :  { %690 = vpow2.f32 %v564_v46  ;;  %v232_v55 = vadd.f32 %v938_v36, %v231_v53  ;;  %v292_v56 = vadd.f32 %v938_v36, %v291_v54 }
 0x113   :  { %692 = vpow2.f32 %v551_v47  ;;  %v554_v57 = vmul.f32 -1.442695, %v237_v51  ;;  %v566_v58 = vmul.f32 -1.442695, %v297_v52 }
 0x114   :  { %694 = vpow2.f32 %v563_v48  ;;  %v553_v59 = vmul.f32 -1.442695, %v232_v55  ;;  %v565_v60 = vmul.f32 -1.442695, %v292_v56  ;;  %v631_v61 = vpop.f32.mrb[4].mxu0  ;;  %v649_v62 = vpop.f32.mrb[4].mxu1 }
 0x115   :  { %696 = vpow2.f32 %v554_v57  ;;  %v247_v63 = vadd.f32 %v631_v61, %v938_v36  ;;  %v307_v0 = vadd.f32 %v649_v62, %v938_v36  ;;  %v241_v1 = vpop.f32.mrb[5].mxu0  ;;  %v301_v2 = vpop.f32.mrb[5].mxu1 }
 0x116   :  { %698 = vpow2.f32 %v566_v58  ;;  %v242_v3 = vadd.f32 %v938_v36, %v241_v1  ;;  %v302_v4 = vadd.f32 %v938_v36, %v301_v2 }
 0x117   :  { %700 = vpow2.f32 %v553_v59  ;;  %v556_v5 = vmul.f32 -1.442695, %v247_v63  ;;  %v568_v6 = vmul.f32 -1.442695, %v307_v0 }
 0x118   :  { %702 = vpow2.f32 %v565_v60  ;;  %v555_v7 = vmul.f32 -1.442695, %v242_v3  ;;  %v567_v8 = vmul.f32 -1.442695, %v302_v4  ;;  %v634_v9 = vpop.f32.mrb[6].mxu0  ;;  %v652_v10 = vpop.f32.mrb[6].mxu1 }
 0x119   :  { %704 = vpow2.f32 %v556_v5  ;;  %v257_v11 = vadd.f32 %v634_v9, %v938_v36  ;;  %v251_v12 = vpop.f32.mrb[7].mxu0  ;;  %v311_v13 = vpop.f32.mrb[7].mxu1  ;;  %v317_v41 = vadd.f32 %v652_v10, %v938_v36 }
 0x11a   :  { %706 = vpow2.f32 %v568_v6  ;;  %v252_v44 = vadd.f32 %v938_v36, %v251_v12  ;;  %v312_v47 = vadd.f32 %v938_v36, %v311_v13 }
 0x11b   :  { %v689_v14 = vpop.eup %688  ;;  %708 = vpow2.f32 %v555_v7  ;;  %v558_v15 = vmul.f32 -1.442695, %v257_v11  ;;  %v570_v53 = vmul.f32 -1.442695, %v317_v41 }
 0x11c   :  { %v691_v16 = vpop.eup %690  ;;  %v413_v17 = vadd.f32 1.0, %v689_v14  ;;  %710 = vpow2.f32 %v567_v8  ;;  %v637_v18 = vpop.f32.mrb[8].mxu0  ;;  %v557_v57 = vmul.f32 -1.442695, %v252_v44  ;;  %v569_v60 = vmul.f32 -1.442695, %v312_v47 }
 0x11d   :  { %v693_v19 = vpop.eup %692  ;;  %v425_v20 = vadd.f32 1.0, %v691_v16  ;;  %712 = vpow2.f32 %v558_v15  ;;  %v655_v21 = vpop.f32.mrb[8].mxu1  ;;  %v267_v50 = vadd.f32 %v637_v18, %v938_v36 }
 0x11e   :  { %v261_v22 = vpop.f32.mrb[9].mxu0  ;;  %v695_v23 = vpop.eup %694  ;;  %714 = vrcp.f32 %v413_v17  ;;  %v412_v24 = vadd.f32 1.0, %v693_v19  ;;  %v327_v54 = vadd.f32 %v655_v21, %v938_v36 }
 0x11f   :  { %v321_v25 = vpop.f32.mrb[9].mxu1  ;;  %v697_v26 = vpop.eup %696  ;;  %716 = vrcp.f32 %v425_v20  ;;  %v424_v27 = vadd.f32 1.0, %v695_v23  ;;  %v262_v58 = vadd.f32 %v938_v36, %v261_v22  ;;  %v560_v63 = vmul.f32 -1.442695, %v267_v50 }
 0x120   :  { %v699_v28 = vpop.eup %698  ;;  %718 = vrcp.f32 %v412_v24  ;;  %v415_v29 = vadd.f32 1.0, %v697_v26  ;;  %v640_v30 = vpop.f32.mrb[10].mxu0  ;;  %v322_v61 = vadd.f32 %v938_v36, %v321_v25  ;;  %v572_v2 = vmul.f32 -1.442695, %v327_v54 }
 0x121   :  { %v701_v31 = vpop.eup %700  ;;  %720 = vrcp.f32 %v424_v27  ;;  %v427_v32 = vadd.f32 1.0, %v699_v28  ;;  %v658_v33 = vpop.f32.mrb[10].mxu1  ;;  %v277_v0 = vadd.f32 %v640_v30, %v938_v36  ;;  %v559_v5 = vmul.f32 -1.442695, %v262_v58 }
 0x122   :  { %v271_v34 = vpop.f32.mrb[11].mxu0  ;;  %v703_v35 = vpop.eup %702  ;;  %722 = vrcp.f32 %v415_v29  ;;  %v414_v37 = vadd.f32 1.0, %v701_v31  ;;  %v337_v3 = vadd.f32 %v658_v33, %v938_v36  ;;  %v571_v8 = vmul.f32 -1.442695, %v322_v61 }
 0x123   :  { %v331_v38 = vpop.f32.mrb[11].mxu1  ;;  %v705_v39 = vpop.eup %704  ;;  %724 = vrcp.f32 %v427_v32  ;;  %v426_v40 = vadd.f32 1.0, %v703_v35  ;;  %v272_v6 = vadd.f32 %v938_v36, %v271_v34  ;;  %v562_v11 = vmul.f32 -1.442695, %v277_v0 }
 0x124   :  { %v707_v42 = vpop.eup %706  ;;  %726 = vrcp.f32 %v414_v37  ;;  %v417_v43 = vadd.f32 1.0, %v705_v39  ;;  %v332_v9 = vadd.f32 %v938_v36, %v331_v38  ;;  %v574_v13 = vmul.f32 -1.442695, %v337_v3 }
 0x125   :  { %v709_v45 = vpop.eup %708  ;;  %728 = vrcp.f32 %v426_v40  ;;  %v429_v46 = vadd.f32 1.0, %v707_v42  ;;  %v561_v15 = vmul.f32 -1.442695, %v272_v6 }
 0x126   :  { %v711_v48 = vpop.eup %710  ;;  %730 = vrcp.f32 %v417_v43  ;;  %v416_v49 = vadd.f32 1.0, %v709_v45  ;;  %v573_v36 = vmul.f32 -1.442695, %v332_v9 }
 0x127   :  { %v713_v51 = vpop.eup %712  ;;  %732 = vrcp.f32 %v429_v46  ;;  %v428_v52 = vadd.f32 1.0, %v711_v48 }
 0x128   :  { %v715_v55 = vpop.eup %714  ;;  %734 = vrcp.f32 %v416_v49  ;;  %v419_v56 = vadd.f32 1.0, %v713_v51 }
 0x129   :  { %v717_v59 = vpop.eup %716  ;;  %485 = vst.msk [vmem:[#allocation7 + $0x8] sm:$0xff] %vm82_vm0, %v715_v55  ;;  %736 = vrcp.f32 %v428_v52 }
 0x12a   :  { %v719_v62 = vpop.eup %718  ;;  %497 = vst.msk [vmem:[#allocation7 + $0x68] sm:$0xff] %vm82_vm0, %v717_v59  ;;  %738 = vrcp.f32 %v419_v56 }
 0x12b   :  { %v721_v1 = vpop.eup %720  ;;  %484 = vst.msk [vmem:[#allocation7] sm:$0xff] %vm82_vm0, %v719_v62  ;;  %740 = vpow2.f32 %v570_v53 }
 0x12c   :  { %v723_v4 = vpop.eup %722  ;;  %496 = vst.msk [vmem:[#allocation7 + $0x60] sm:$0xff] %vm82_vm0, %v721_v1  ;;  %742 = vpow2.f32 %v557_v57 }
 0x12d   :  { %v725_v7 = vpop.eup %724  ;;  %487 = vst.msk [vmem:[#allocation7 + $0x18] sm:$0xff] %vm82_vm0, %v723_v4  ;;  %744 = vpow2.f32 %v569_v60 }
 0x12e   :  { %v727_v10 = vpop.eup %726  ;;  %499 = vst.msk [vmem:[#allocation7 + $0x78] sm:$0xff] %vm82_vm0, %v725_v7  ;;  %746 = vpow2.f32 %v560_v63 }
 0x12f   :  { %v729_v12 = vpop.eup %728  ;;  %486 = vst.msk [vmem:[#allocation7 + $0x10] sm:$0xff] %vm82_vm0, %v727_v10  ;;  %748 = vpow2.f32 %v572_v2 }
 0x130   :  { %v731_v14 = vpop.eup %730  ;;  %498 = vst.msk [vmem:[#allocation7 + $0x70] sm:$0xff] %vm82_vm0, %v729_v12  ;;  %750 = vpow2.f32 %v559_v5 }
 0x131   :  { %v733_v16 = vpop.eup %732  ;;  %489 = vst.msk [vmem:[#allocation7 + $0x28] sm:$0xff] %vm82_vm0, %v731_v14  ;;  %752 = vpow2.f32 %v571_v8 }
 0x132   :  { %v735_v17 = vpop.eup %734  ;;  %501 = vst.msk [vmem:[#allocation7 + $0x88] sm:$0xff] %vm82_vm0, %v733_v16  ;;  %754 = vpow2.f32 %v562_v11 }
 0x133   :  { %v737_v18 = vpop.eup %736  ;;  %488 = vst.msk [vmem:[#allocation7 + $0x20] sm:$0xff] %vm82_vm0, %v735_v17  ;;  %756 = vpow2.f32 %v574_v13 }
 0x134   :  { %v739_v19 = vpop.eup %738  ;;  %500 = vst.msk [vmem:[#allocation7 + $0x80] sm:$0xff] %vm82_vm0, %v737_v18  ;;  %758 = vpow2.f32 %v561_v15 }
 0x135   :  { %v741_v20 = vpop.eup %740  ;;  %491 = vst.msk [vmem:[#allocation7 + $0x38] sm:$0xff] %vm82_vm0, %v739_v19  ;;  %760 = vpow2.f32 %v573_v36 }
 0x136   :  { %v743_v21 = vpop.eup %742  ;;  %v431_v22 = vadd.f32 1.0, %v741_v20 }
 0x137   :  { %v745_v23 = vpop.eup %744  ;;  %v418_v24 = vadd.f32 1.0, %v743_v21 }
 0x138   :  { %v747_v25 = vpop.eup %746  ;;  %762 = vrcp.f32 %v431_v22  ;;  %v430_v26 = vadd.f32 1.0, %v745_v23 }
 0x139   :  { %v749_v27 = vpop.eup %748  ;;  %764 = vrcp.f32 %v418_v24  ;;  %v421_v28 = vadd.f32 1.0, %v747_v25 }
 0x13a   :  { %v751_v29 = vpop.eup %750  ;;  %766 = vrcp.f32 %v430_v26  ;;  %v433_v30 = vadd.f32 1.0, %v749_v27 }
 0x13b   :  { %v753_v31 = vpop.eup %752  ;;  %768 = vrcp.f32 %v421_v28  ;;  %v420_v32 = vadd.f32 1.0, %v751_v29 }
 0x13c   :  { %v755_v33 = vpop.eup %754  ;;  %770 = vrcp.f32 %v433_v30  ;;  %v432_v34 = vadd.f32 1.0, %v753_v31 }
 0x13d   :  { %v757_v35 = vpop.eup %756  ;;  %772 = vrcp.f32 %v420_v32  ;;  %v423_v37 = vadd.f32 1.0, %v755_v33 }
 0x13e   :  { %v759_v38 = vpop.eup %758  ;;  %774 = vrcp.f32 %v432_v34  ;;  %v435_v39 = vadd.f32 1.0, %v757_v35 }
 0x13f   :  { %v761_v40 = vpop.eup %760  ;;  %776 = vrcp.f32 %v423_v37  ;;  %v422_v41 = vadd.f32 1.0, %v759_v38 }
 0x140   :  { %778 = vrcp.f32 %v435_v39  ;;  %v434_v42 = vadd.f32 1.0, %v761_v40 }
 0x141   :  { %780 = vrcp.f32 %v422_v41 }
 0x142   :  { %v763_v43 = vpop.eup %762  ;;  %782 = vrcp.f32 %v434_v42 }
 0x143   :  { %v765_v44 = vpop.eup %764  ;;  %503 = vst.msk [vmem:[#allocation7 + $0x98] sm:$0xff] %vm82_vm0, %v763_v43 }
 0x144   :  { %v767_v45 = vpop.eup %766  ;;  %490 = vst.msk [vmem:[#allocation7 + $0x30] sm:$0xff] %vm82_vm0, %v765_v44 }
 0x145   :  { %v769_v46 = vpop.eup %768  ;;  %502 = vst.msk [vmem:[#allocation7 + $0x90] sm:$0xff] %vm82_vm0, %v767_v45 }
 0x146   :  { %v771_v47 = vpop.eup %770  ;;  %493 = vst.msk [vmem:[#allocation7 + $0x48] sm:$0xff] %vm82_vm0, %v769_v46 }
 0x147   :  { %v773_v48 = vpop.eup %772  ;;  %505 = vst.msk [vmem:[#allocation7 + $0xa8] sm:$0xff] %vm82_vm0, %v771_v47 }
 0x148   :  { %v775_v49 = vpop.eup %774  ;;  %492 = vst.msk [vmem:[#allocation7 + $0x40] sm:$0xff] %vm82_vm0, %v773_v48 }
 0x149   :  { %v777_v50 = vpop.eup %776  ;;  %504 = vst.msk [vmem:[#allocation7 + $0xa0] sm:$0xff] %vm82_vm0, %v775_v49 }
 0x14a   :  { %v779_v51 = vpop.eup %778  ;;  %495 = vst.msk [vmem:[#allocation7 + $0x58] sm:$0xff] %vm82_vm0, %v777_v50 }
 0x14b   :  { %v781_v52 = vpop.eup %780  ;;  %507 = vst.msk [vmem:[#allocation7 + $0xb8] sm:$0xff] %vm82_vm0, %v779_v51 }
 0x14c   :  { %v783_v53 = vpop.eup %782  ;;  %494 = vst.msk [vmem:[#allocation7 + $0x50] sm:$0xff] %vm82_vm0, %v781_v52 }
 0x14d   :  { %506 = vst.msk [vmem:[#allocation7 + $0xb0] sm:$0xff] %vm82_vm0, %v783_v53 }
 0x14e   :  { %839 = shalt.err (!%p836_p6)
}
 0x14f   :  { %s840_s15 = scalar_lea.hbm %s1006_s3, 3072 }
 0x150   :  { %p841_p7 = scmp.ne.s32.totalorder %s1006_s3, %s840_s15  ;;  %p844_p8 = scmp.lt.u32.totalorder %s840_s15, %s1006_s3 }
 0x152   :  { %p846_p9 = pnand %p844_p8, %p841_p7 }
 0x154   :  { %849 = shalt.err (!%p846_p9)
}
 0x155   :  { %519 = dma.vmem_to_hbm [thread:$0]  %s514_s11, 3072, %s1006_s3, [#allocation4], %s857_s22, %s857_s22, %s858_s23  }
 0x156   :  { %854 = dma.done.wait [#allocation4], 3072  }
 0x157   :  { %855 = vsyncadd [#allocation4], 4294964224 }
 0x158   :  { %523 = vsyncpa [#allocation3], 1 }
 0x159   :  { %524 = vsyncpa [#allocation6], 1 }
 0x15a   :  { %525 = vsyncpa [#allocation4], 1 }

</bundles_post_ra>
